<compile_context>
chip_gen: v7x
topology: tpu7x:2x2x1
jax: 0.10.0
libtpu: 0.0.40
codegen_flags: <defaults>
</compile_context>

<pallas_src>
import functools

import jax
import jax.numpy as jnp
from jax.experimental import pallas as pl
from jax.experimental.pallas import tpu as pltpu

BN_EPS = 1e-5


# ------------------------------ fused Pallas kernel ------------------------------ #

def _fused_cnn_kernel(L1p, L2,
                      ns_ref, p1_ref, w1_ref, g1_ref, be1_ref,
                      w2_ref, g2_ref, be2_ref,
                      out_ref,
                      y1e_ref, y2_ref):
    """conv1 + BN1 + conv2 + BN2 + AvgPool1d(2), all on-chip.

    ns_ref  : (2,)            f32 SMEM  [1/(B*L1), 1/(B*L2)]
    p1_ref  : (R, CK1p)       bf16      conv1 im2col patches, R = B*L1p (rows padded per batch)
    w1_ref  : (CK1p, C1p)     bf16      conv1 weight matrix (lane-padded columns are zero)
    w2_ref  : (K2*C1p, C2p)   bf16      conv2 weights packed for the single big-K matmul
    g*/be*  : (1, C*p)        f32       BN gamma / beta (pad entries are 0)
    out_ref : (R//2, C2p)     f32       pooled output, rows ordered b*(L1p//2) + p
    y1e_ref : (R+8, C1p)      bf16      scratch: bf16 y1n + zeroed overhang for shifted taps
    y2_ref  : (R, C2p)        f32       scratch: conv2 output, read back with stride-2 rows
    """
    R = p1_ref.shape[0]
    C1p = w1_ref.shape[1]
    C2p = w2_ref.shape[1]
    K2 = w2_ref.shape[0] // C1p
    half = R // 2

    inv_n1 = ns_ref[0]
    inv_n2 = ns_ref[1]

    # ---- conv1: one MXU matmul (conv bias dropped: it cancels exactly under the
    # batch-statistic BatchNorm that follows).
    y1 = jnp.dot(p1_ref[...], w1_ref[...],
                 preferred_element_type=jnp.float32)             # (R, C1p) f32

    # ---- BN1 (training-mode batch statistics, biased variance). Padded rows / lanes
    # are zero, so sums over the padded array divided by the true count are exact.
    # TODO(synk): use a centered / two-pass variance if activations stop being roughly
    # zero-mean (E[x^2] - mean^2 cancels catastrophically when |mean| >> std).
    mean1 = jnp.sum(y1, axis=0, keepdims=True) * inv_n1
    var1 = jnp.sum(y1 * y1, axis=0, keepdims=True) * inv_n1 - mean1 * mean1
    scale1 = g1_ref[...] * jax.lax.rsqrt(var1 + BN_EPS)
    shift1 = be1_ref[...] - mean1 * scale1
    y1n = y1 * scale1 + shift1                                   # (R, C1p) f32

    # ---- Single f32->bf16 cast of y1n into the extended scratch; zero the overhang so
    # the last batch's shifted taps read zeros instead of stale VMEM.
    y1e_ref[:R, :] = y1n.astype(jnp.bfloat16)
    y1e_ref[R:, :] = jnp.zeros((y1e_ref.shape[0] - R, C1p), jnp.bfloat16)

    # ---- conv2 as ONE big-K MXU matmul: lane-concatenate the K2 statically shifted row
    # slices of the bf16 scratch into an (R, K2*C1p) im2col and multiply once against the
    # packed weight (keeps the systolic array fed; no per-tap VPU adds or casts).
    # Per-batch row padding keeps every valid output row's taps inside its own batch.
    p2 = jnp.concatenate([y1e_ref[k:k + R, :] for k in range(K2)], axis=1)
    y2 = jnp.dot(p2, w2_ref[...], preferred_element_type=jnp.float32)   # (R, C2p) f32

    # ---- BN2 statistics over valid rows only; mask built in-kernel from iota.
    row = jax.lax.broadcasted_iota(jnp.int32, (R, 1), 0)
    valid = (row % L1p) < L2
    y2m = jnp.where(valid, y2, 0.0)
    mean2 = jnp.sum(y2m, axis=0, keepdims=True) * inv_n2
    var2 = jnp.sum(y2m * y2m, axis=0, keepdims=True) * inv_n2 - mean2 * mean2
    scale2 = g2_ref[...] * jax.lax.rsqrt(var2 + BN_EPS)
    shift2 = be2_ref[...] - mean2 * scale2

    # ---- AvgPool1d(kernel=2, stride=2): VPU pair-sum of even/odd conv2 rows via
    # sublane-strided loads (no selection-matrix matmul). Each pool window sums to 1,
    # so the BN2 affine commutes with the pool and is applied to the halved row count.
    y2_ref[...] = y2
    even = y2_ref[pl.ds(0, half, stride=2), :]
    odd = y2_ref[pl.ds(1, half, stride=2), :]
    pooled = (even + odd) * 0.5                                   # (R//2, C2p) f32
    out_ref[...] = pooled * scale2 + shift2


# --------------------------------- JAX wrapper ----------------------------------- #

def _round_up(v, m):
    return (v + m - 1) // m * m


def cnn_module_forward(x, params):
    """x: (B, C_in, L) float32 (NCW like PyTorch). Returns (B, Cout * floor(L2/2))."""
    w1, b1, g1, be1, w2, b2, g2, be2 = params
    del b1, b2  # per-channel conv bias cancels exactly under batch-stat BatchNorm
    B, Cin, L = x.shape
    Cmid, _, K1 = w1.shape
    S1 = 2
    Cout, _, K2 = w2.shape
    L1 = (L - K1) // S1 + 1
    L2 = L1 - K2 + 1
    Lp = L2 // 2

    CK1 = Cin * K1
    CK1p = _round_up(CK1, 8)      # sublane-aligned contraction dim; NOT inflated to 128
    C1p = _round_up(Cmid, 128)
    C2p = _round_up(Cout, 128)
    L1p = _round_up(L1, 8)
    R = B * L1p

    # conv1 im2col: K1 strided slices; column order (c, k) matches w1.reshape(Cmid, Cin*K1).
    sl = [x[:, :, k:k + S1 * (L1 - 1) + 1:S1] for k in range(K1)]        # each (B, Cin, L1)
    p1 = jnp.stack(sl, axis=-1).transpose(0, 2, 1, 3).reshape(B, L1, CK1)
    p1 = jnp.pad(p1, ((0, 0), (0, L1p - L1), (0, CK1p - CK1)))
    p1 = p1.reshape(R, CK1p).astype(jnp.bfloat16)

    # Padded weight / BN parameter matrices (pad entries zero -> padded channels stay 0).
    w1m = jnp.pad(w1.reshape(Cmid, CK1).T,
                  ((0, CK1p - CK1), (0, C1p - Cmid))).astype(jnp.bfloat16)
    # conv2 weights packed for the big-K matmul: row k*C1p + m, column c  <-  w2[c, m, k].
    w2m = jnp.pad(jnp.transpose(w2, (2, 1, 0)),                           # (K2, Cmid, Cout)
                  ((0, 0), (0, C1p - Cmid), (0, C2p - Cout)))
    w2m = w2m.reshape(K2 * C1p, C2p).astype(jnp.bfloat16)
    g1p = jnp.pad(g1, (0, C1p - Cmid)).reshape(1, C1p).astype(jnp.float32)
    be1p = jnp.pad(be1, (0, C1p - Cmid)).reshape(1, C1p).astype(jnp.float32)
    g2p = jnp.pad(g2, (0, C2p - Cout)).reshape(1, C2p).astype(jnp.float32)
    be2p = jnp.pad(be2, (0, C2p - Cout)).reshape(1, C2p).astype(jnp.float32)

    # BN normalizers as SMEM scalars.
    ns = jnp.array([1.0 / (B * L1), 1.0 / (B * L2)], jnp.float32)

    kernel = functools.partial(_fused_cnn_kernel, L1p, L2)
    vmem = pl.BlockSpec(memory_space=pltpu.MemorySpace.VMEM)
    smem = pl.BlockSpec(memory_space=pltpu.MemorySpace.SMEM)

    pooled = pl.pallas_call(
        kernel,
        out_shape=jax.ShapeDtypeStruct((R // 2, C2p), jnp.float32),
        in_specs=[smem] + [vmem] * 7,
        out_specs=vmem,
        scratch_shapes=[pltpu.VMEM((R + 8, C1p), jnp.bfloat16),
                        pltpu.VMEM((R, C2p), jnp.float32)],
    )(ns, p1, w1m, g1p, be1p, w2m, g2p, be2p)

    # nn.Flatten on the NCW-pooled tensor: out[b, c*Lp + p] (tiny XLA glue).
    out = pooled.reshape(B, L1p // 2, C2p)[:, :Lp, :Cout]
    return out.transpose(0, 2, 1).reshape(B, Cout * Lp)


# ------------------------------ pure-JAX reference -------------------------------- #

def _ref_conv1d(x, w, b, stride):
    B, Cin, L = x.shape
    Cout, _, K = w.shape
    Lo = (L - K) // stride + 1
    cols = jnp.stack([x[:, :, stride * t:stride * t + K] for t in range(Lo)], axis=2)
    y = jnp.einsum('bclk,ock->bol', cols, w, precision=jax.lax.Precision.HIGHEST)
    return y + b[None, :, None]


def _ref_bn(y, g, beta):
    mean = y.mean(axis=(0, 2), keepdims=True)
    var = ((y - mean) ** 2).mean(axis=(0, 2), keepdims=True)
    return (y - mean) / jnp.sqrt(var + BN_EPS) * g[None, :, None] + beta[None, :, None]


def ref_forward(x, params):
    w1, b1, g1, be1, w2, b2, g2, be2 = params
    y1 = _ref_bn(_ref_conv1d(x, w1, b1, 2), g1, be1)
    y2 = _ref_bn(_ref_conv1d(y1, w2, b2, 1), g2, be2)
    B, C, L2 = y2.shape
    Lp = L2 // 2
    yp = y2[:, :, :2 * Lp].reshape(B, C, Lp, 2).mean(-1)
    return yp.reshape(B, -1)


# -------------------------------------- main --------------------------------------- #

if __name__ == "__main__":
    key = jax.random.PRNGKey(0)
    B, Cin, L = 2, 4, 32
    k1, k2, k3, k4, k5, k6, k7, k8, kx = jax.random.split(key, 9)

    # Deterministic synthetic parameters (shapes from CNN_MODULE.__init__):
    w1 = jax.random.normal(k1, (200, Cin, 5), jnp.float32) * 0.10   # Conv1d(Cin, 200, 5, stride=2)
    b1 = jax.random.normal(k2, (200,), jnp.float32) * 0.10
    w2 = jax.random.normal(k3, (100, 200, 4), jnp.float32) * 0.05   # Conv1d(200, 100, 4, stride=1)
    b2 = jax.random.normal(k4, (100,), jnp.float32) * 0.10
    g1 = 1.0 + 0.1 * jax.random.normal(k5, (200,), jnp.float32)     # BatchNorm1d(200)
    be1 = 0.1 * jax.random.normal(k6, (200,), jnp.float32)
    g2 = 1.0 + 0.1 * jax.random.normal(k7, (100,), jnp.float32)     # BatchNorm1d(100)
    be2 = 0.1 * jax.random.normal(k8, (100,), jnp.float32)
    params = (w1, b1, g1, be1, w2, b2, g2, be2)

    x = jax.random.normal(kx, (B, Cin, L), jnp.float32)

    out = jax.block_until_ready(cnn_module_forward(x, params))
    ref = jax.block_until_ready(ref_forward(x, params))

    Lp = ((L - 5) // 2 + 1 - 4 + 1) // 2
    assert out.shape == ref.shape == (B, 100 * Lp), out.shape
    # bf16 MXU operands vs. f32-HIGHEST reference -> a few-percent tolerance.
    max_err = float(jnp.max(jnp.abs(out - ref)))
    assert jnp.allclose(out, ref, atol=3e-2, rtol=3e-2), max_err
    print("KERNEL_OK")
</pallas_src>

<mosaic_0001>
module attributes {stable_mosaic.version = 11 : i64} {
  func.func @_fused_cnn_kernel(%arg0: memref<2xf32, #tpu.memory_space<smem>>, %arg1: memref<32x24xbf16, #tpu.memory_space<vmem>>, %arg2: memref<24x256xbf16, #tpu.memory_space<vmem>>, %arg3: memref<1x256xf32, #tpu.memory_space<vmem>>, %arg4: memref<1x256xf32, #tpu.memory_space<vmem>>, %arg5: memref<1024x128xbf16, #tpu.memory_space<vmem>>, %arg6: memref<1x128xf32, #tpu.memory_space<vmem>>, %arg7: memref<1x128xf32, #tpu.memory_space<vmem>>, %arg8: memref<16x128xf32, #tpu.memory_space<vmem>>, %arg9: memref<40x256xbf16, #tpu.memory_space<vmem>>, %arg10: memref<32x128xf32, #tpu.memory_space<vmem>>) attributes {dimension_semantics = [], scalar_prefetch = 0 : i64, scratch_operands = 2 : i64, tpu.core_type = #tpu.core_type<tc>} {
    %c0 = arith.constant 0 : index
    %0 = memref.load %arg0[%c0] : memref<2xf32, #tpu.memory_space<smem>>
    %c1 = arith.constant 1 : index
    %1 = memref.load %arg0[%c1] : memref<2xf32, #tpu.memory_space<smem>>
    %c0_0 = arith.constant 0 : index
    %c0_1 = arith.constant 0 : index
    %2 = vector.load %arg1[%c0_0, %c0_1] : memref<32x24xbf16, #tpu.memory_space<vmem>>, vector<32x24xbf16>
    %c0_2 = arith.constant 0 : index
    %c0_3 = arith.constant 0 : index
    %3 = vector.load %arg2[%c0_2, %c0_3] : memref<24x256xbf16, #tpu.memory_space<vmem>>, vector<24x256xbf16>
    %cst = arith.constant dense<0.000000e+00> : vector<32x256xf32>
    %4 = tpu.matmul %2, %3, %cst {dimension_numbers = #tpu.dot_dimension_numbers<[1], [0], [0], [1], [0, 0, 1, 1], [], []>} : vector<32x24xbf16>, vector<24x256xbf16>, vector<32x256xf32> -> vector<32x256xf32>
    %cst_4 = arith.constant dense<0.000000e+00> : vector<256xf32>
    %5 = vector.multi_reduction <add>, %4, %cst_4 [0] : vector<32x256xf32> to vector<256xf32>
    %6 = vector.shape_cast %5 : vector<256xf32> to vector<1x256xf32>
    %7 = vector.broadcast %0 : f32 to vector<1x256xf32>
    %8 = arith.mulf %6, %7 : vector<1x256xf32>
    %9 = arith.mulf %4, %4 : vector<32x256xf32>
    %cst_5 = arith.constant dense<0.000000e+00> : vector<256xf32>
    %10 = vector.multi_reduction <add>, %9, %cst_5 [0] : vector<32x256xf32> to vector<256xf32>
    %11 = vector.shape_cast %10 : vector<256xf32> to vector<1x256xf32>
    %12 = vector.broadcast %0 : f32 to vector<1x256xf32>
    %13 = arith.mulf %11, %12 : vector<1x256xf32>
    %14 = arith.mulf %8, %8 : vector<1x256xf32>
    %15 = arith.subf %13, %14 : vector<1x256xf32>
    %c0_6 = arith.constant 0 : index
    %c0_7 = arith.constant 0 : index
    %16 = vector.load %arg3[%c0_6, %c0_7] : memref<1x256xf32, #tpu.memory_space<vmem>>, vector<1x256xf32>
    %cst_8 = arith.constant 9.99999974E-6 : f32
    %17 = vector.broadcast %cst_8 : f32 to vector<1x256xf32>
    %18 = arith.addf %15, %17 : vector<1x256xf32>
    %19 = math.rsqrt %18 : vector<1x256xf32>
    %20 = arith.mulf %16, %19 : vector<1x256xf32>
    %c0_9 = arith.constant 0 : index
    %c0_10 = arith.constant 0 : index
    %21 = vector.load %arg4[%c0_9, %c0_10] : memref<1x256xf32, #tpu.memory_space<vmem>>, vector<1x256xf32>
    %22 = arith.mulf %8, %20 : vector<1x256xf32>
    %23 = arith.subf %21, %22 : vector<1x256xf32>
    %24 = vector.broadcast %20 : vector<1x256xf32> to vector<32x256xf32>
    %25 = arith.mulf %4, %24 : vector<32x256xf32>
    %26 = vector.broadcast %23 : vector<1x256xf32> to vector<32x256xf32>
    %27 = arith.addf %25, %26 : vector<32x256xf32>
    %28 = arith.truncf %27 : vector<32x256xf32> to vector<32x256xbf16>
    %c0_11 = arith.constant 0 : index
    %c0_12 = arith.constant 0 : index
    %29 = vector.load %arg9[%c0_11, %c0_12] : memref<40x256xbf16, #tpu.memory_space<vmem>>, vector<32x256xbf16>
    tpu.vector_store %arg9[%c0_11, %c0_12], %28 {strides = array<i32>} : memref<40x256xbf16, #tpu.memory_space<vmem>>, vector<32x256xbf16>,
    %cst_13 = arith.constant 0.000000e+00 : bf16
    %30 = vector.broadcast %cst_13 : bf16 to vector<8x256xbf16>
    %c32 = arith.constant 32 : index
    %c0_14 = arith.constant 0 : index
    %31 = vector.load %arg9[%c32, %c0_14] : memref<40x256xbf16, #tpu.memory_space<vmem>>, vector<8x256xbf16>
    tpu.vector_store %arg9[%c32, %c0_14], %30 {strides = array<i32>} : memref<40x256xbf16, #tpu.memory_space<vmem>>, vector<8x256xbf16>,
    %c0_15 = arith.constant 0 : index
    %c0_16 = arith.constant 0 : index
    %32 = vector.load %arg9[%c0_15, %c0_16] : memref<40x256xbf16, #tpu.memory_space<vmem>>, vector<32x256xbf16>
    %c1_17 = arith.constant 1 : index
    %c0_18 = arith.constant 0 : index
    %33 = vector.load %arg9[%c1_17, %c0_18] : memref<40x256xbf16, #tpu.memory_space<vmem>>, vector<32x256xbf16>
    %c2 = arith.constant 2 : index
    %c0_19 = arith.constant 0 : index
    %34 = vector.load %arg9[%c2, %c0_19] : memref<40x256xbf16, #tpu.memory_space<vmem>>, vector<32x256xbf16>
    %c3 = arith.constant 3 : index
    %c0_20 = arith.constant 0 : index
    %35 = vector.load %arg9[%c3, %c0_20] : memref<40x256xbf16, #tpu.memory_space<vmem>>, vector<32x256xbf16>
    %36 = tpu.concatenate %32, %33, %34, %35 in 1 : vector<32x256xbf16>, vector<32x256xbf16>, vector<32x256xbf16>, vector<32x256xbf16> -> vector<32x1024xbf16>
    %c0_21 = arith.constant 0 : index
    %c0_22 = arith.constant 0 : index
    %37 = vector.load %arg5[%c0_21, %c0_22] : memref<1024x128xbf16, #tpu.memory_space<vmem>>, vector<1024x128xbf16>
    %cst_23 = arith.constant dense<0.000000e+00> : vector<32x128xf32>
    %38 = tpu.matmul %36, %37, %cst_23 {dimension_numbers = #tpu.dot_dimension_numbers<[1], [0], [0], [1], [0, 0, 1, 1], [], []>} : vector<32x1024xbf16>, vector<1024x128xbf16>, vector<32x128xf32> -> vector<32x128xf32>
    %39 = tpu.iota {dimensions = array<i32: 0>} : vector<32x1xi32>
    %c16_i32 = arith.constant 16 : i32
    %c0_i32 = arith.constant 0 : i32
    %40 = arith.cmpi eq, %c16_i32, %c0_i32 : i32
    %c1_i32 = arith.constant 1 : i32
    %41 = arith.select %40, %c1_i32, %c16_i32 : i32
    %42 = vector.broadcast %41 : i32 to vector<32x1xi32>
    %43 = arith.remsi %39, %42 : vector<32x1xi32>
    %c0_i32_24 = arith.constant 0 : i32
    %44 = vector.broadcast %c0_i32_24 : i32 to vector<32x1xi32>
    %45 = arith.cmpi ne, %43, %44 : vector<32x1xi32>
    %c0_i32_25 = arith.constant 0 : i32
    %46 = vector.broadcast %c0_i32_25 : i32 to vector<32x1xi32>
    %47 = arith.cmpi slt, %43, %46 : vector<32x1xi32>
    %c0_i32_26 = arith.constant 0 : i32
    %48 = arith.cmpi slt, %41, %c0_i32_26 : i32
    %49 = vector.broadcast %48 : i1 to vector<32x1xi1>
    %50 = vector.broadcast %49 : vector<32x1xi1> to vector<32x1xi1>
    %51 = arith.xori %47, %50 : vector<32x1xi1>
    %52 = arith.andi %51, %45 : vector<32x1xi1>
    %53 = vector.broadcast %41 : i32 to vector<32x1xi32>
    %54 = arith.addi %43, %53 : vector<32x1xi32>
    %55 = arith.select %52, %54, %43 : vector<32x1xi1>, vector<32x1xi32>
    %c11_i32 = arith.constant 11 : i32
    %56 = vector.broadcast %c11_i32 : i32 to vector<32x1xi32>
    %57 = arith.cmpi slt, %55, %56 : vector<32x1xi32>
    %cst_27 = arith.constant 0.000000e+00 : f32
    %58 = vector.shape_cast %57 : vector<32x1xi1> to vector<32x1xi1>
    %59 = vector.broadcast %58 : vector<32x1xi1> to vector<32x128xi1>
    %60 = vector.broadcast %cst_27 : f32 to vector<32x128xf32>
    %61 = arith.select %59, %38, %60 : vector<32x128xi1>, vector<32x128xf32>
    %cst_28 = arith.constant dense<0.000000e+00> : vector<128xf32>
    %62 = vector.multi_reduction <add>, %61, %cst_28 [0] : vector<32x128xf32> to vector<128xf32>
    %63 = vector.shape_cast %62 : vector<128xf32> to vector<1x128xf32>
    %64 = vector.broadcast %1 : f32 to vector<1x128xf32>
    %65 = arith.mulf %63, %64 : vector<1x128xf32>
    %66 = arith.mulf %61, %61 : vector<32x128xf32>
    %cst_29 = arith.constant dense<0.000000e+00> : vector<128xf32>
    %67 = vector.multi_reduction <add>, %66, %cst_29 [0] : vector<32x128xf32> to vector<128xf32>
    %68 = vector.shape_cast %67 : vector<128xf32> to vector<1x128xf32>
    %69 = vector.broadcast %1 : f32 to vector<1x128xf32>
    %70 = arith.mulf %68, %69 : vector<1x128xf32>
    %71 = arith.mulf %65, %65 : vector<1x128xf32>
    %72 = arith.subf %70, %71 : vector<1x128xf32>
    %c0_30 = arith.constant 0 : index
    %c0_31 = arith.constant 0 : index
    %73 = vector.load %arg6[%c0_30, %c0_31] : memref<1x128xf32, #tpu.memory_space<vmem>>, vector<1x128xf32>
    %cst_32 = arith.constant 9.99999974E-6 : f32
    %74 = vector.broadcast %cst_32 : f32 to vector<1x128xf32>
    %75 = arith.addf %72, %74 : vector<1x128xf32>
    %76 = math.rsqrt %75 : vector<1x128xf32>
    %77 = arith.mulf %73, %76 : vector<1x128xf32>
    %c0_33 = arith.constant 0 : index
    %c0_34 = arith.constant 0 : index
    %78 = vector.load %arg7[%c0_33, %c0_34] : memref<1x128xf32, #tpu.memory_space<vmem>>, vector<1x128xf32>
    %79 = arith.mulf %65, %77 : vector<1x128xf32>
    %80 = arith.subf %78, %79 : vector<1x128xf32>
    %c0_35 = arith.constant 0 : index
    %c0_36 = arith.constant 0 : index
    %81 = vector.load %arg10[%c0_35, %c0_36] : memref<32x128xf32, #tpu.memory_space<vmem>>, vector<32x128xf32>
    tpu.vector_store %arg10[%c0_35, %c0_36], %38 {strides = array<i32>} : memref<32x128xf32, #tpu.memory_space<vmem>>, vector<32x128xf32>,
    %c0_37 = arith.constant 0 : index
    %c0_38 = arith.constant 0 : index
    %82 = tpu.strided_load %arg10[%c0_37, %c0_38] {strides = array<i32: 2, 1>} : memref<32x128xf32, #tpu.memory_space<vmem>>, vector<16x128xf32>
    %c1_39 = arith.constant 1 : index
    %c0_40 = arith.constant 0 : index
    %83 = tpu.strided_load %arg10[%c1_39, %c0_40] {strides = array<i32: 2, 1>} : memref<32x128xf32, #tpu.memory_space<vmem>>, vector<16x128xf32>
    %84 = arith.addf %82, %83 : vector<16x128xf32>
    %cst_41 = arith.constant 5.000000e-01 : f32
    %85 = vector.broadcast %cst_41 : f32 to vector<16x128xf32>
    %86 = arith.mulf %84, %85 : vector<16x128xf32>
    %87 = vector.broadcast %77 : vector<1x128xf32> to vector<16x128xf32>
    %88 = arith.mulf %86, %87 : vector<16x128xf32>
    %89 = vector.broadcast %80 : vector<1x128xf32> to vector<16x128xf32>
    %90 = arith.addf %88, %89 : vector<16x128xf32>
    %c0_42 = arith.constant 0 : index
    %c0_43 = arith.constant 0 : index
    %91 = vector.load %arg8[%c0_42, %c0_43] : memref<16x128xf32, #tpu.memory_space<vmem>>, vector<16x128xf32>
    tpu.vector_store %arg8[%c0_42, %c0_43], %90 {strides = array<i32>} : memref<16x128xf32, #tpu.memory_space<vmem>>, vector<16x128xf32>,
    return
  }
}

</mosaic_0001>

<bundles_post_ra>
// kernel: tpu_custom_call.1
= control target key start
LH: loop header
LB: loop body
LE: loop exit
PB: predicated region body
PF: predicated region fallthrough
CT: control target
= control target key end

     0   :  { %13 = vsyncpa [#allocation7], 0  ;;  %s1937_s0 = inlined_call_operand.vmem [shape: f32[2], index: 0, kind: input, shape index: {}]   ;;  %s1938_s1 = inlined_call_operand.vmem [shape: bf16[32,24], index: 1, kind: input, shape index: {}]   ;;  %s1939_s2 = inlined_call_operand.vmem [shape: bf16[24,256], index: 2, kind: input, shape index: {}]   ;;  %s1940_s3 = inlined_call_operand.vmem [shape: f32[1,256], index: 3, kind: input, shape index: {}]   ;;  %s1941_s4 = inlined_call_operand.vmem [shape: f32[1,256], index: 4, kind: input, shape index: {}]   ;;  %s1942_s5 = inlined_call_operand.hbm [shape: bf16[1024,128], index: 5, kind: input, shape index: {}]   ;;  %s1943_s6 = inlined_call_operand.vmem [shape: f32[1,128], index: 6, kind: input, shape index: {}]   ;;  %s1944_s7 = inlined_call_operand.vmem [shape: f32[1,128], index: 7, kind: input, shape index: {}]   ;;  %s1945_s8 = inlined_call_operand.hbm [shape: f32[16,128], index: 8, kind: output, shape index: {}]  }
   0x1   :  { %14 = vsyncpa [#allocation5], 0 }
   0x2   :  { %15 = vsyncpa [#allocation6], 0  ;;  %s22_s29 = sshll.u32 %s1937_s0, 4  ;;  %s23_s29 = int_to_ptr.vmem [resolvable:$true] %s22_s29 }
   0x3   :  { %s1658_s30 = scalar_lea.vmem %s23_s29, 16  ;;  %p1663_p1 = scmp.lt.s32.totalorder %s23_s29, %s23_s29 }
   0x4   :  { %p1659_p0 = scmp.ne.s32.totalorder %s23_s29, %s1658_s30  ;;  %p1664_p2 = scmp.lt.s32.totalorder %s1658_s30, %s1658_s30 }
   0x6   :  { %p1665_p3 = por %p1664_p2, %p1663_p1 }
   0x8   :  { %p1666_p4 = pnand %p1665_p3, %p1659_p0 }
   0xa   :  { %1669 = shalt.err (!%p1666_p4)
}
   0xb   :  { %s1720_s9 = smov [#allocation4]   ;;  %s1721_s10 = smov [#allocation8]  }
   0xc   :  { %25 = dma.vmem_to_smem %s23_s29, 16, %s1720_s9, [#allocation7]  }
   0xd   :  { %s39_s11 = sshll.u32 %s1721_s10, 4  ;;  %s1670_s14 = scalar_lea.hbm %s1942_s5, 8192  ;;  %s40_s11 = int_to_ptr.vmem [resolvable:$true] %s39_s11 }
   0xe   :  { %p1671_p5 = scmp.ne.s32.totalorder %s1942_s5, %s1670_s14  ;;  %p1674_p6 = scmp.lt.u32.totalorder %s1670_s14, %s1942_s5 }
  0x10   :  { %p1676_p7 = pnand %p1674_p6, %p1671_p5 }
  0x12   :  { %1679 = shalt.err (!%p1676_p7)
}
  0x13   :  { %s1680_s18 = scalar_lea.vmem %s40_s11, 8192  ;;  %p1685_p9 = scmp.lt.s32.totalorder %s40_s11, %s40_s11 }
  0x14   :  { %p1681_p8 = scmp.ne.s32.totalorder %s40_s11, %s1680_s18  ;;  %p1686_p10 = scmp.lt.s32.totalorder %s1680_s18, %s1680_s18 }
  0x16   :  { %p1687_p11 = por %p1686_p10, %p1685_p9 }
  0x18   :  { %p1688_p12 = pnand %p1687_p11, %p1681_p8 }
  0x1a   :  { %1691 = shalt.err (!%p1688_p12)
}
  0x1b   :  { %s1722_s19 = smov 64   ;;  %s1723_s20 = smov 4  }
  0x1c   :  { %45 = dma.hbm_to_vmem [thread:$0]  %s1942_s5, 8192, %s40_s11, [#allocation5], %s1722_s19, %s1722_s19, %s1723_s20  }
  0x1d   :  { %1714 = dma.done.wait [#allocation7], 16  }
  0x1e   :  { %1715 = vsyncadd [#allocation7], 4294967280 }
  0x1f   :  { %1716 = dma.done.wait [#allocation5], 8192  }
  0x20   :  { %1717 = vsyncadd [#allocation5], 4294959104 }
  0x21   :  { %56 = sfence }
  0x22   :  { %v1573_v0 = vld [vmem:[%s1939_s2 + $0x4] ss:$8 sps:$4 sm:$0xff]   ;;  %v1575_v1 = vld [vmem:[%s1939_s2] ss:$8 sps:$4 sm:$0xff]   ;;  %v66_v2 = vld [vmem:[%s1939_s2 + $0x10] sm:$0xff]  ;;  %vm99_vm0 = vcmask 1043456  }
  0x23   :  { %v1724_v3 = vmov 0   ;;  %106 = vmatprep.subr.bf16.mxu0 %v1573_v0  ;;  %v1362_v4 = vcombine.high %v66_v2, %v66_v2  ;;  %v1361_v5 = vcombine.low %v66_v2, %v66_v2  ;;  %vm92_vm1 = vcmask 195584   ;;  %v1578_v7 = vld [vmem:[%s1938_s1] sm:$0xff]   ;;  %v1579_v8 = vld [vmem:[%s1938_s1 + $0x8] sm:$0xff]   ;;  %v1582_v11 = vld [vmem:[#allocation8 + $0x48] sm:$0xff]   ;;  %s58_s1 = sld [smem:[#allocation4]] }
  0x24   :  { %138 = vmatprep.mubr.bf16.mxu0 %v1724_v3  ;;  %324 = vst [vmem:[#allocation2 + $0x20] sm:$0xff] %v1724_v3  ;;  %107 = vmatpush1.bf16.msra.mxu0 %v1575_v1  ;;  %v1580_v9 = vld [vmem:[#allocation8 + $0x40] sm:$0xff]   ;;  %v1583_v12 = vld [vmem:[#allocation8 + $0x8] sm:$0xff]   ;;  %v1585_v14 = vld [vmem:[#allocation8 + $0x50] sm:$0xff]   ;;  %vm377_vm2 = vsmask.f32 7424 }
  0x25   :  { %1363 = vmatprep.subr.msk.bf16.mxu0 %vm99_vm0, %v1362_v4  ;;  %v101_v6 = vsel %vm99_vm0, %v1361_v5, 0  ;;  %v1581_v10 = vld [vmem:[#allocation8] sm:$0xff]   ;;  %1452 = vmatprep.subr.bf16.mxu1 %v1580_v9  ;;  %v1587_v16 = vld [vmem:[#allocation8 + $0x10] sm:$0xff]   ;;  %v1588_v17 = vld [vmem:[#allocation8 + $0xc8] sm:$0xff]   ;;  %vm427_vm3 = vcmask 1046528   ;;  %s1726_s16 = smov [#allocation9]  }
  0x26   :  { %1453 = vmatpush3.bf16.msra.mxu1 %v1581_v10  ;;  %v1584_v13 = vld [vmem:[#allocation8 + $0xc0] sm:$0xff]   ;;  %v1589_v18 = vld [vmem:[#allocation8 + $0x58] sm:$0xff]   ;;  %v1590_v19 = vld [vmem:[#allocation8 + $0x88] sm:$0xff]   ;;  %vm447_vm4 = vsmask.f32 6400 }
  0x27   :  { %1454 = vmatprep.subr.bf16.mxu1 %v1582_v11  ;;  %v1586_v15 = vld [vmem:[#allocation8 + $0x80] sm:$0xff]   ;;  %v1591_v20 = vld [vmem:[#allocation8 + $0x18] sm:$0xff]   ;;  %v1592_v21 = vld [vmem:[#allocation8 + $0xd0] sm:$0xff]  }
  0x28   :  { %109 = vmatpush1.bf16.msra.mxu0 %v101_v6  ;;  %v1593_v22 = vld [vmem:[#allocation8 + $0x60] sm:$0xff]   ;;  %v1594_v23 = vld [vmem:[#allocation8 + $0x90] sm:$0xff]   ;;  %v1596_v25 = vld [vmem:[#allocation8 + $0xd8] sm:$0xff]  }
  0x29   :  { %1480 = vmatprep.subr.bf16.mxu0 %v1584_v13  ;;  %v1595_v24 = vld [vmem:[#allocation8 + $0x20] sm:$0xff]   ;;  %v1597_v26 = vld [vmem:[#allocation8 + $0x68] sm:$0xff]   ;;  %v1598_v27 = vld [vmem:[#allocation8 + $0x98] sm:$0xff]  }
  0x2a   :  { %1455 = vmatpush3.bf16.msra.mxu1 %v1583_v12  ;;  %v1599_v28 = vld [vmem:[#allocation8 + $0x28] sm:$0xff]   ;;  %v1600_v29 = vld [vmem:[#allocation8 + $0xe0] sm:$0xff]   ;;  %v1601_v30 = vld [vmem:[#allocation8 + $0x70] sm:$0xff]  }
  0x2b   :  { %1364 = vmatmul.mubr.msk.bf16.vlgmr.msra.gmra.mrb[0].mxu0 %vm92_vm1, %v1578_v7  ;;  %1456 = vmatprep.subr.bf16.mxu1 %v1585_v14  ;;  %v1602_v31 = vld [vmem:[#allocation8 + $0xa0] sm:$0xff]   ;;  %v1603_v32 = vld [vmem:[#allocation8 + $0x30] sm:$0xff]   ;;  %v1604_v33 = vld [vmem:[#allocation8 + $0xe8] sm:$0xff]  }
  0x2c   :  { %148 = vmatprep.mubr.bf16.mxu0 %v1724_v3  ;;  %1481 = vmatpush3.bf16.msra.mxu0 %v1586_v15  ;;  %v1605_v34 = vld [vmem:[#allocation8 + $0x78] sm:$0xff]   ;;  %v1606_v35 = vld [vmem:[#allocation8 + $0xa8] sm:$0xff]   ;;  %v1608_v37 = vld [vmem:[#allocation8 + $0xf0] sm:$0xff]  }
  0x2d   :  { %1482 = vmatprep.subr.bf16.mxu0 %v1588_v17  ;;  %v1607_v36 = vld [vmem:[#allocation8 + $0x38] sm:$0xff]   ;;  %v1609_v38 = vld [vmem:[#allocation8 + $0xb0] sm:$0xff]   ;;  %v1610_v39 = vld [vmem:[#allocation8 + $0x140] sm:$0xff]  }
  0x2e   :  { %1457 = vmatpush3.bf16.msra.mxu1 %v1587_v16  ;;  %v1612_v40 = vld [vmem:[#allocation8 + $0xf8] sm:$0xff]   ;;  %v1616_v42 = vld [vmem:[#allocation8 + $0x1c0] sm:$0xff]  }
  0x2f   :  { %1458 = vmatprep.subr.bf16.mxu1 %v1589_v18  ;;  %v1613_v41 = vld [vmem:[#allocation8 + $0xb8] sm:$0xff]  }
  0x30   :  { %1483 = vmatpush3.bf16.msra.mxu0 %v1590_v19 }
  0x31   :  { %1484 = vmatprep.subr.bf16.mxu0 %v1592_v21 }
  0x32   :  { %1459 = vmatpush3.bf16.msra.mxu1 %v1591_v20 }
  0x33   :  { %1365 = vmatmul.mubr.msk.bf16.gmra.mrb[4].mxu0 %vm92_vm1, %v1579_v8  ;;  %1460 = vmatprep.subr.bf16.mxu1 %v1593_v22 }
  0x34   :  { %1485 = vmatpush3.bf16.msra.mxu0 %v1594_v23  ;;  %v177_v23 = vstv %s58_s1 }
  0x35   :  { %1486 = vmatprep.subr.bf16.mxu0 %v1596_v25 }
  0x36   :  { %1461 = vmatpush3.bf16.msra.mxu1 %v1595_v24 }
  0x37   :  { %1462 = vmatprep.subr.bf16.mxu1 %v1597_v26 }
  0x38   :  { %1487 = vmatpush3.bf16.msra.mxu0 %v1598_v27 }
  0x39   :  { %1488 = vmatprep.subr.bf16.mxu0 %v1600_v29 }
  0x3a   :  { %1463 = vmatpush3.bf16.msra.mxu1 %v1599_v28 }
  0x3b   :  { %1464 = vmatprep.subr.bf16.mxu1 %v1601_v30 }
  0x3c   :  { %1489 = vmatpush3.bf16.msra.mxu0 %v1602_v31 }
  0x3d   :  { %1490 = vmatprep.subr.bf16.mxu0 %v1604_v33 }
  0x3e   :  { %1465 = vmatpush3.bf16.msra.mxu1 %v1603_v32 }
  0x3f   :  { %1466 = vmatprep.subr.bf16.mxu1 %v1605_v34 }
  0x40   :  { %1491 = vmatpush3.bf16.msra.mxu0 %v1606_v35 }
  0x41   :  { %1492 = vmatprep.subr.bf16.mxu0 %v1608_v37 }
  0x42   :  { %1467 = vmatpush3.bf16.msra.mxu1 %v1607_v36 }
  0x43   :  { %1508 = vmatprep.subr.bf16.mxu1 %v1610_v39 }
  0x44   :  { %1493 = vmatpush3.bf16.msra.mxu0 %v1609_v38 }
  0x45   :  { %1494 = vmatprep.subr.bf16.mxu0 %v1612_v40 }
  0x48   :  { %1495 = vmatpush3.bf16.msra.mxu0 %v1613_v41 }
  0x49   :  { %1536 = vmatprep.subr.bf16.mxu0 %v1616_v42  ;;  %v1725_v42 = vmov 1966171168  }
  0xfe   :  { %v1804_v43 = vpop.f32.mrb[0].mxu0 }
  0xff   :  { %v1806_v44 = vpop.f32.mrb[1].mxu0  ;;  %v180_v46 = vmul.f32 %v1804_v43, %v1804_v43 }
 0x100   :  { %v1808_v45 = vpop.f32.mrb[2].mxu0  ;;  %v181_v50 = vmul.f32 %v1806_v44, %v1806_v44 }
 0x101   :  { %v159_v47 = vadd.f32 %v1808_v45, %v1804_v43  ;;  %v182_v48 = vmul.f32 %v1808_v45, %v1808_v45  ;;  %v1816_v49 = vpop.f32.mrb[3].mxu0 }
 0x102   :  { %v168_v51 = vadd.f32 %v1816_v49, %v1806_v44  ;;  %v183_v52 = vmul.f32 %v1816_v49, %v1816_v49 }
 0x103   :  { %v188_v53 = vadd.f32 %v182_v48, %v180_v46  ;;  %v221_v46 = vunpack.c.l.s4 %v1725_v42  ;;  %v1617_v42 = vld [vmem:[#allocation8 + $0x150] sm:$0xff]  }
 0x104   :  { %v197_v54 = vadd.f32 %v183_v52, %v181_v50 }
 0x105   :  { %v222_v48 = vunpack.c.0.s8 %v221_v46 }
 0x106   :  { %v1824_v55 = vpop.f32.mrb[4].mxu0 }
 0x107   :  { %v160_v56 = vadd.f32 %v159_v47, %v1824_v55  ;;  %v184_v57 = vmul.f32 %v1824_v55, %v1824_v55  ;;  %v1829_v58 = vpop.f32.mrb[5].mxu0  ;;  %v223_v47 = vlaneseq }
 0x108   :  { %v169_v59 = vadd.f32 %v168_v51, %v1829_v58  ;;  %v185_v60 = vmul.f32 %v1829_v58, %v1829_v58  ;;  %v1834_v61 = vpop.f32.mrb[6].mxu0 }
 0x109   :  { %v189_v62 = vadd.f32 %v188_v53, %v184_v57  ;;  %v161_v63 = vadd.f32 %v160_v56, %v1834_v61  ;;  %v186_v0 = vmul.f32 %v1834_v61, %v1834_v61  ;;  %v1839_v1 = vpop.f32.mrb[7].mxu0  ;;  %v1844_v50 = vshrl.u32 %v223_v47, 7  ;;  %v212_v57 = vld [vmem:[%s1940_s3] sm:$0x3] }
 0x10a   :  { %v198_v2 = vadd.f32 %v197_v54, %v185_v60  ;;  %v170_v3 = vadd.f32 %v169_v59, %v1839_v1  ;;  %v187_v4 = vmul.f32 %v1839_v1, %v1839_v1 }
 0x10b   :  { %v162_v5 = vrot.slane %v161_v63, 4  ;;  %v190_v6 = vadd.f32 %v189_v62, %v186_v0  ;;  %v225_v52 = vsub.s32 %v222_v48, %v1844_v50  ;;  %v1851_v60 = vsub.s32 0, %v1844_v50 }
 0x10c   :  { %v171_v7 = vrot.slane %v170_v3, 4  ;;  %v199_v8 = vadd.f32 %v198_v2, %v187_v4  ;;  %v244_v62 = vsub.s32 1, %v1844_v50 }
 0x10d   :  { %v163_v9 = vadd.f32 %v162_v5, %v161_v63  ;;  %v191_v10 = vrot.slane %v190_v6, 4 }
 0x10e   :  { %v172_v11 = vadd.f32 %v171_v7, %v170_v3  ;;  %v200_v12 = vrot.slane %v199_v8, 4 }
 0x10f   :  { %v164_v13 = vrot.slane %v163_v9, 2  ;;  %v192_v14 = vadd.f32 %v191_v10, %v190_v6 }
 0x110   :  { %v173_v15 = vrot.slane %v172_v11, 2  ;;  %v201_v16 = vadd.f32 %v200_v12, %v199_v8 }
 0x111   :  { %v165_v17 = vadd.f32 %v164_v13, %v163_v9  ;;  %v193_v18 = vrot.slane %v192_v14, 2 }
 0x112   :  { %v174_v19 = vadd.f32 %v173_v15, %v172_v11  ;;  %v202_v20 = vrot.slane %v201_v16, 2 }
 0x113   :  { %v166_v21 = vrot.slane %v165_v17, 1  ;;  %v194_v22 = vadd.f32 %v193_v18, %v192_v14 }
 0x114   :  { %v175_v24 = vrot.slane %v174_v19, 1  ;;  %v203_v25 = vadd.f32 %v202_v20, %v201_v16 }
 0x115   :  { %v167_v26 = vadd.f32 %v166_v21, %v165_v17  ;;  %v195_v27 = vrot.slane %v194_v22, 1 }
 0x116   :  { %v176_v28 = vadd.f32 %v175_v24, %v174_v19  ;;  %v204_v29 = vrot.slane %v203_v25, 1 }
 0x117   :  { %v178_v30 = vmul.f32 %v177_v23, %v167_v26  ;;  %v196_v31 = vadd.f32 %v195_v27, %v194_v22  ;;  %v333_v22 = vld [vmem:[#allocation2 + $0x20] sm:$0x11]  ;;  %v1614_v27 = vld [vmem:[#allocation8 + $0x148] sm:$0xff]  }
 0x118   :  { %v179_v32 = vmul.f32 %v177_v23, %v176_v28  ;;  %v205_v33 = vadd.f32 %v204_v29, %v203_v25  ;;  %v1611_v25 = vld [vmem:[#allocation8 + $0x100] sm:$0xff]   ;;  %v1871_v29 = vcombine.high %v333_v22, %v333_v22 }
 0x119   :  { %v206_v34 = vmul.f32 %v196_v31, %v177_v23  ;;  %v208_v35 = vmul.f32 %v178_v30, %v178_v30 }
 0x11a   :  { %v207_v36 = vmul.f32 %v205_v33, %v177_v23  ;;  %v209_v37 = vmul.f32 %v179_v32, %v179_v32 }
 0x11b   :  { %v210_v38 = vsub.f32 %v206_v34, %v208_v35  ;;  %v414_v34 = vshll.u32 %v1871_v29, 16  ;;  %v1876_v35 = vcombine.low %v333_v22, %v333_v22 }
 0x11c   :  { %v211_v39 = vsub.f32 %v207_v36, %v209_v37  ;;  %v1615_v36 = vld [vmem:[#allocation8 + $0x108] sm:$0xff]  }
 0x11d   :  { %v213_v40 = vadd.f32 1e-05, %v210_v38 }
 0x11e   :  { %v214_v41 = vadd.f32 1e-05, %v211_v39 }
 0x11f   :  { %1648 = vrsqrt.f32 %v213_v40 }
 0x120   :  { %1650 = vrsqrt.f32 %v214_v41 }
 0x129   :  { %v1649_v51 = vpop.eup %1648 }
 0x12a   :  { %v1651_v53 = vpop.eup %1650 }
 0x12b   :  { %v219_v54 = vcombine.low %v1649_v51, %v1651_v53  ;;  %v1618_v53 = vld [vmem:[#allocation8 + $0x180] sm:$0xff]  }
 0x12d   :  { %v226_v56 = vrot.slane %v219_v54, %v225_v52 }
 0x12f   :  { %v233_v59 = vrot.slane %v226_v56, %v225_v52  ;;  %v416_v56 = vrot.slane %v414_v34, 1 }
 0x131   :  { %v235_v63 = vmul.f32 %v233_v59, %v212_v57 }
 0x133   :  { %v241_v0 = vrot.slane %v235_v63, %v1851_v60  ;;  %v245_v2 = vrot.slane %v235_v63, %v244_v62 }
 0x135   :  { %v248_v3 = vmul.f32 %v241_v0, %v178_v30  ;;  %v249_v4 = vmul.f32 %v245_v2, %v179_v32  ;;  %v269_v5 = vmul.f32 %v241_v0, %v1804_v43  ;;  %v270_v6 = vmul.f32 %v245_v2, %v1806_v44  ;;  %v236_v43 = vld [vmem:[%s1941_s4] sm:$0x3]  ;;  %s1356_s4 = sld [smem:[#allocation4 + $0x1]] }
 0x136   :  { %v271_v7 = vmul.f32 %v241_v0, %v1808_v45  ;;  %v272_v8 = vmul.f32 %v245_v2, %v1816_v49  ;;  %v273_v9 = vmul.f32 %v241_v0, %v1824_v55  ;;  %v274_v10 = vmul.f32 %v245_v2, %v1829_v58 }
 0x137   :  { %v252_v11 = vcombine.low %v248_v3, %v249_v4  ;;  %v275_v12 = vmul.f32 %v241_v0, %v1834_v61  ;;  %v276_v13 = vmul.f32 %v245_v2, %v1839_v1  ;;  %v1620_v2 = vld [vmem:[#allocation8 + $0x110] sm:$0xff]  }
 0x139   :  { %v259_v14 = vrot.slane %v252_v11, %v225_v52  ;;  %v1622_v11 = vld [vmem:[#allocation8 + $0x158] sm:$0xff]  }
 0x13b   :  { %v266_v15 = vrot.slane %v259_v14, %v225_v52 }
 0x13d   :  { %v268_v44 = vsub.f32 %v236_v43, %v266_v15  ;;  %v1623_v15 = vld [vmem:[#allocation8 + $0x188] sm:$0xff]  }
 0x13f   :  { %v281_v45 = vrot.slane %v268_v44, %v1851_v60  ;;  %v285_v16 = vrot.slane %v268_v44, %v244_v62  ;;  %v406_v62 = vshll.u32 %v1876_v35, 16 }
 0x141   :  { %v288_v49 = vadd.f32 %v281_v45, %v269_v5  ;;  %v289_v17 = vadd.f32 %v285_v16, %v270_v6  ;;  %v290_v55 = vadd.f32 %v281_v45, %v271_v7  ;;  %v291_v18 = vadd.f32 %v285_v16, %v272_v8  ;;  %v1621_v5 = vld [vmem:[#allocation8 + $0x1c8] sm:$0xff]  }
 0x142   :  { %v292_v58 = vadd.f32 %v281_v45, %v273_v9  ;;  %v293_v19 = vadd.f32 %v285_v16, %v274_v10  ;;  %v294_v20 = vadd.f32 %v281_v45, %v275_v12  ;;  %v295_v61 = vadd.f32 %v285_v16, %v276_v13 }
 0x143   :  { %v1448_v21 = vpack.c.bf16 %v289_v17, %v288_v49  ;;  %v1449_v1 = vpack.c.bf16 %v291_v18, %v290_v55  ;;  %v1654_v23 = vpack.c.bf16 %v290_v55, %v288_v49  ;;  %v1655_v24 = vpack.c.bf16 %v291_v18, %v289_v17  ;;  %v1624_v17 = vld [vmem:[#allocation8 + $0x118] sm:$0xff]   ;;  %v1625_v55 = vld [vmem:[#allocation8 + $0x1d0] sm:$0xff]  }
 0x144   :  { %v1867_v26 = vpack.c.bf16 %v295_v61, %v293_v19  ;;  %v1869_v28 = vpack.c.bf16 %v294_v20, %v292_v58  ;;  %v408_v61 = vrot.slane %v406_v62, 1 }
 0x145   :  { %320 = vst [vmem:[#allocation2] sm:$0xff] %v1448_v21  ;;  %1038 = vmatprep.mubr.bf16.mxu1 %v1655_v24  ;;  %v393_v30 = vshll.u32 %v1655_v24, 16  ;;  %v381_v31 = vshll.u32 %v1654_v23, 16  ;;  %v391_v37 = vshrl.u32 %v1655_v24, 16  ;;  %v379_v39 = vshrl.u32 %v1654_v23, 16  ;;  %v1627_v21 = vld [vmem:[#allocation8 + $0x160] sm:$0xff]  }
 0x146   :  { %1039 = vmatmul.mubr.bf16.vlgmr.msra.gmra.mrb[0].mxu1 %v1654_v23  ;;  %v398_v32 = vshll.u32 %v1867_v26, 16  ;;  %v386_v33 = vshll.u32 %v1869_v28, 16  ;;  %v410_v46 = vshrl.u32 %v1867_v26, 16  ;;  %v402_v47 = vshrl.u32 %v1869_v28, 16 }
 0x147   :  { %1509 = vmatpush3.bf16.msra.mxu1 %v1611_v25  ;;  %1046 = vmatprep.mubr.bf16.mxu1 %v1867_v26  ;;  %v395_v38 = vrot.slane %v393_v30, 1  ;;  %v383_v40 = vrot.slane %v381_v31, 1  ;;  %v432_v59 = vrot.slane %v1867_v26, 1  ;;  %v429_v9 = vrot.slane %v1869_v28, 1  ;;  %v1628_v25 = vld [vmem:[#allocation8 + $0x190] sm:$0xff]   ;;  %v1629_v31 = vld [vmem:[#allocation8 + $0x120] sm:$0xff]  }
 0x148   :  { %1510 = vmatprep.subr.bf16.mxu1 %v1614_v27  ;;  %v400_v41 = vrot.slane %v398_v32, 1  ;;  %v388_v52 = vrot.slane %v386_v33, 1  ;;  %v456_v6 = vrot.slane %v402_v47, 1  ;;  %v468_v7 = vrot.slane %v410_v46, 1 }
 0x149   :  { %v396_v48 = vor.u32 %v395_v38, %v391_v37  ;;  %v384_v51 = vor.u32 %v383_v40, %v379_v39  ;;  %v469_v8 = vrot.slane %v398_v32, 2  ;;  %v457_v16 = vrot.slane %v386_v33, 2  ;;  %v1630_v33 = vld [vmem:[#allocation8 + $0x1d8] sm:$0xff]   ;;  %v1633_v39 = vld [vmem:[#allocation8 + $0x128] sm:$0xff]   ;;  %v1634_v40 = vld [vmem:[#allocation8 + $0x1e0] sm:$0xff]  }
 0x14a   :  { %v412_v54 = vor.u32 %v410_v46, %v400_v41  ;;  %v404_v20 = vor.u32 %v402_v47, %v388_v52  ;;  %v1632_v38 = vld [vmem:[#allocation8 + $0x198] sm:$0xff]   ;;  %v1637_v47 = vld [vmem:[#allocation8 + $0x130] sm:$0xff]  }
 0x14b   :  { %1511 = vmatpush3.bf16.msra.mxu1 %v1615_v36  ;;  %v401_v63 = vsel %vm377_vm2, %v396_v48, %v400_v41  ;;  %v389_v0 = vsel %vm377_vm2, %v384_v51, %v388_v52  ;;  %v1894_v24 = vor.u32 %v469_v8, %v468_v7  ;;  %v1896_v30 = vor.u32 %v457_v16, %v456_v6  ;;  %v1631_v36 = vld [vmem:[#allocation8 + $0x168] sm:$0xff]   ;;  %v1635_v41 = vld [vmem:[#allocation8 + $0x170] sm:$0xff]   ;;  %v335_v46 = vld [vmem:[#allocation2 + $0x20] sm:$0x33] }
 0x14c   :  { %v334_v57 = vld [vmem:[#allocation2] sm:$0xee]  ;;  %1087 = vmatprep.mubr.bf16.mxu0 %v401_v63  ;;  %1512 = vmatprep.subr.bf16.mxu1 %v1617_v42  ;;  %v417_v43 = vsel %vm377_vm2, %v412_v54, %v416_v56  ;;  %v409_v34 = vsel %vm377_vm2, %v404_v20, %v408_v61  ;;  %v1636_v42 = vld [vmem:[#allocation8 + $0x1a0] sm:$0xff]   ;;  %v1638_v48 = vld [vmem:[#allocation8 + $0x1e8] sm:$0xff]   ;;  %v1383_v52 = vcombine.high %v335_v46, %v335_v46 }
 0x14d   :  { %v1380_v3 = vcombine.low %v334_v57, %v1449_v1  ;;  %v1381_v4 = vcombine.high %v334_v57, %v1449_v1  ;;  %1088 = vmatmul.mubr.bf16.vlgmr.msra.gmra.mrb[8].mxu0 %v389_v0  ;;  %v1639_v51 = vld [vmem:[#allocation8 + $0x178] sm:$0xff]   ;;  %v1642_v56 = vld [vmem:[#allocation8 + $0x1f0] sm:$0xff]   ;;  %v436_v0 = vrot.slane %v1871_v29, 1 }
 0x14e   :  { %1537 = vmatpush3.bf16.msra.mxu0 %v1618_v53  ;;  %1047 = vmatmul.mubr.bf16.gmra.mrb[4].mxu1 %v1869_v28  ;;  %v1640_v53 = vld [vmem:[#allocation8 + $0x1a8] sm:$0xff]   ;;  %v1641_v54 = vld [vmem:[#allocation8 + $0x138] sm:$0xff]   ;;  %v482_v57 = vshrl.u32 %v1383_v52, 16  ;;  %v485_v62 = vshll.u32 %v1383_v52, 16  ;;  %v1643_v63 = vld [vmem:[#allocation8 + $0x1b0] sm:$0xff]  }
 0x14f   :  { %v431_v10 = vrot.slane %v1381_v4, 1  ;;  %v461_v12 = vshrl.u32 %v1381_v4, 16  ;;  %v464_v13 = vshll.u32 %v1381_v4, 16  ;;  %v428_v14 = vrot.slane %v1380_v3, 1  ;;  %1095 = vmatprep.mubr.bf16.mxu0 %v417_v43  ;;  %1513 = vmatpush3.bf16.msra.mxu1 %v1620_v2  ;;  %v1644_v2 = vld [vmem:[#allocation8 + $0x1f8] sm:$0xff]  }
 0x150   :  { %v449_v44 = vshrl.u32 %v1380_v3, 16  ;;  %v452_v45 = vshll.u32 %v1380_v3, 16  ;;  %1538 = vmatprep.subr.bf16.mxu0 %v1621_v5  ;;  %1514 = vmatprep.subr.bf16.mxu1 %v1622_v11  ;;  %v1382_v3 = vcombine.low %v335_v46, %v335_v46  ;;  %v484_v4 = vrot.slane %v482_v57, 1  ;;  %v1645_v7 = vld [vmem:[#allocation8 + $0x1b8] sm:$0xff]  }
 0x151   :  { %v433_v49 = vsel %vm427_vm3, %v431_v10, %v432_v59  ;;  %v463_v18 = vrot.slane %v461_v12, 1  ;;  %v466_v58 = vrot.slane %v464_v13, 2  ;;  %v430_v19 = vsel %vm427_vm3, %v428_v14, %v429_v9 }
 0x152   :  { %1136 = vmatprep.mubr.bf16.mxu1 %v433_v49  ;;  %v451_v1 = vrot.slane %v449_v44, 1  ;;  %v454_v22 = vrot.slane %v452_v45, 2  ;;  %1539 = vmatpush3.bf16.msra.mxu0 %v1623_v15  ;;  %v487_v5 = vrot.slane %v485_v62, 2  ;;  %v437_v6 = vsel %vm427_vm3, %v432_v59, %v436_v0 }
 0x153   :  { %v467_v23 = vor.u32 %v466_v58, %v463_v18  ;;  %1515 = vmatpush3.bf16.msra.mxu1 %v1624_v17  ;;  %1540 = vmatprep.subr.bf16.mxu0 %v1625_v55  ;;  %v473_v8 = vshrl.u32 %v1382_v3, 16  ;;  %v476_v10 = vshll.u32 %v1382_v3, 16  ;;  %v434_v11 = vrot.slane %v1876_v35, 1 }
 0x154   :  { %v455_v27 = vor.u32 %v454_v22, %v451_v1  ;;  %1516 = vmatprep.subr.bf16.mxu1 %v1627_v21  ;;  %v488_v29 = vor.u32 %v487_v5, %v484_v4 }
 0x155   :  { %v471_v32 = vsel %vm447_vm4, %v467_v23, %v1894_v24  ;;  %1096 = vmatmul.mubr.bf16.gmra.mrb[12].mxu0 %v409_v34  ;;  %v475_v12 = vrot.slane %v473_v8, 1  ;;  %v478_v13 = vrot.slane %v476_v10, 2  ;;  %v435_v14 = vsel %vm427_vm3, %v429_v9, %v434_v11 }
 0x156   :  { %v459_v37 = vsel %vm447_vm4, %v455_v27, %v1896_v30  ;;  %1541 = vmatpush3.bf16.msra.mxu0 %v1628_v25  ;;  %1185 = vmatprep.mubr.bf16.mxu0 %v471_v32  ;;  %v489_v26 = vsel %vm447_vm4, %v1894_v24, %v488_v29  ;;  %v1206_v8 = vadd.s32 24, %v1844_v50 }
 0x157   :  { %1517 = vmatpush3.bf16.msra.mxu1 %v1629_v31  ;;  %1542 = vmatprep.subr.bf16.mxu0 %v1630_v33  ;;  %v479_v59 = vor.u32 %v478_v13, %v475_v12 }
 0x158   :  { %1518 = vmatprep.subr.bf16.mxu1 %v1631_v36 }
 0x159   :  { %v480_v43 = vsel %vm447_vm4, %v1896_v30, %v479_v59 }
 0x15a   :  { %1543 = vmatpush3.bf16.msra.mxu0 %v1632_v38 }
 0x15b   :  { %1519 = vmatpush3.bf16.msra.mxu1 %v1633_v39  ;;  %1544 = vmatprep.subr.bf16.mxu0 %v1634_v40 }
 0x15c   :  { %1520 = vmatprep.subr.bf16.mxu1 %v1635_v41 }
 0x15e   :  { %1545 = vmatpush3.bf16.msra.mxu0 %v1636_v42 }
 0x15f   :  { %1521 = vmatpush3.bf16.msra.mxu1 %v1637_v47  ;;  %1546 = vmatprep.subr.bf16.mxu0 %v1638_v48  ;;  %v1204_v47 = vadd.s32 8, %v1844_v50 }
 0x160   :  { %1522 = vmatprep.subr.bf16.mxu1 %v1639_v51 }
 0x162   :  { %1547 = vmatpush3.bf16.msra.mxu0 %v1640_v53 }
 0x163   :  { %1523 = vmatpush3.bf16.msra.mxu1 %v1641_v54  ;;  %1548 = vmatprep.subr.bf16.mxu0 %v1642_v56  ;;  %v1218_v54 = vand.u32 15, %v1204_v47 }
 0x165   :  { %vm1256_vm5 = vcmp.lt.s32.totalorder %v1218_v54, 11  ;;  %v1302_v54 = vld [vmem:[%s1944_s7] sm:$0x1] }
 0x166   :  { %1137 = vmatmul.mubr.bf16.vlgmr.msra.gmra.mrb[8].mxu1 %v430_v19  ;;  %1549 = vmatpush3.bf16.msra.mxu0 %v1643_v63 }
 0x167   :  { %1144 = vmatprep.mubr.bf16.mxu1 %v437_v6  ;;  %1550 = vmatprep.subr.bf16.mxu0 %v1644_v2 }
 0x16a   :  { %1551 = vmatpush3.bf16.msra.mxu0 %v1645_v7 }
 0x16d   :  { %1186 = vmatmul.mubr.bf16.vlgmr.msra.gmra.mrb[16].mxu0 %v459_v37 }
 0x16e   :  { %1145 = vmatmul.mubr.bf16.gmra.mrb[12].mxu1 %v435_v14  ;;  %1193 = vmatprep.mubr.bf16.mxu0 %v489_v26 }
 0x175   :  { %1194 = vmatmul.mubr.bf16.gmra.mrb[20].mxu0 %v480_v43  ;;  %v1232_v43 = vand.u32 15, %v1206_v8 }
 0x177   :  { %vm1258_vm6 = vcmp.lt.s32.totalorder %v1232_v43, 11 }
 0x219   :  { %v1468_v35 = vpop.f32.mrb[0].mxu1 }
 0x21a   :  { %v1469_v15 = vpop.f32.mrb[1].mxu1 }
 0x21b   :  { %v1470_v44 = vadd.f32 %v1469_v15, %v1468_v35  ;;  %v1471_v45 = vpop.f32.mrb[2].mxu1 }
 0x21c   :  { %v1472_v16 = vpop.f32.mrb[3].mxu1 }
 0x21d   :  { %v1473_v49 = vadd.f32 %v1472_v16, %v1471_v45 }
 0x220   :  { %v1496_v17 = vpop.f32.mrb[8].mxu0 }
 0x221   :  { %v1474_v28 = vpop.f32.mrb[4].mxu1  ;;  %v1497_v55 = vpop.f32.mrb[9].mxu0 }
 0x222   :  { %v1498_v9 = vadd.f32 %v1497_v55, %v1496_v17  ;;  %v1475_v18 = vpop.f32.mrb[5].mxu1  ;;  %v1499_v58 = vpop.f32.mrb[10].mxu0 }
 0x223   :  { %v1476_v19 = vadd.f32 %v1475_v18, %v1474_v28  ;;  %v1477_v20 = vpop.f32.mrb[6].mxu1  ;;  %v1500_v61 = vpop.f32.mrb[11].mxu0 }
 0x224   :  { %v1090_v21 = vadd.f32 %v1498_v9, %v1470_v44  ;;  %v1501_v1 = vadd.f32 %v1500_v61, %v1499_v58  ;;  %v1478_v22 = vpop.f32.mrb[7].mxu1 }
 0x225   :  { %v1479_v23 = vadd.f32 %v1478_v22, %v1477_v20 }
 0x226   :  { %v1093_v24 = vadd.f32 %v1501_v1, %v1473_v49 }
 0x228   :  { %v1502_v25 = vpop.f32.mrb[12].mxu0 }
 0x229   :  { %v1503_v27 = vpop.f32.mrb[13].mxu0 }
 0x22a   :  { %v1504_v30 = vadd.f32 %v1503_v27, %v1502_v25  ;;  %v1505_v31 = vpop.f32.mrb[14].mxu0 }
 0x22b   :  { %v1506_v32 = vpop.f32.mrb[15].mxu0 }
 0x22c   :  { %v1098_v33 = vadd.f32 %v1504_v30, %v1476_v19  ;;  %v1507_v34 = vadd.f32 %v1506_v32, %v1505_v31  ;;  %v1280_v30 = vstv %s1356_s4 }
 0x22e   :  { %v1101_v36 = vadd.f32 %v1507_v34, %v1479_v23 }
 0x239   :  { %v1524_v37 = vpop.f32.mrb[8].mxu1 }
 0x23a   :  { %v1525_v38 = vpop.f32.mrb[9].mxu1 }
 0x23b   :  { %v1526_v39 = vadd.f32 %v1525_v38, %v1524_v37  ;;  %v1527_v40 = vpop.f32.mrb[10].mxu1 }
 0x23c   :  { %v1528_v41 = vpop.f32.mrb[11].mxu1 }
 0x23d   :  { %v1139_v42 = vadd.f32 %v1526_v39, %v1090_v21  ;;  %v1529_v46 = vadd.f32 %v1528_v41, %v1527_v40  ;;  %v1298_v40 = vld [vmem:[%s1943_s6] sm:$0x1]  ;;  %s1343_s6 = sshll.u32 %s1726_s16, 4  ;;  %s1344_s6 = int_to_ptr.vmem [resolvable:$true] %s1343_s6 }
 0x23e   :  { %s1692_s0 = scalar_lea.vmem %s1344_s6, 256  ;;  %p1697_p0 = scmp.lt.s32.totalorder %s1344_s6, %s1344_s6 }
 0x23f   :  { %v1142_v48 = vadd.f32 %v1529_v46, %v1093_v24  ;;  %p1693_p13 = scmp.ne.s32.totalorder %s1344_s6, %s1692_s0  ;;  %p1698_p1 = scmp.lt.s32.totalorder %s1692_s0, %s1692_s0 }
 0x240   :  { %v1552_v51 = vpop.f32.mrb[16].mxu0 }
 0x241   :  { %v1530_v52 = vpop.f32.mrb[12].mxu1  ;;  %v1553_v53 = vpop.f32.mrb[17].mxu0  ;;  %p1699_p2 = por %p1698_p1, %p1697_p0 }
 0x242   :  { %v1554_v56 = vadd.f32 %v1553_v53, %v1552_v51  ;;  %v1531_v57 = vpop.f32.mrb[13].mxu1  ;;  %v1555_v62 = vpop.f32.mrb[18].mxu0 }
 0x243   :  { %v1532_v63 = vadd.f32 %v1531_v57, %v1530_v52  ;;  %v1533_v0 = vpop.f32.mrb[14].mxu1  ;;  %v1556_v2 = vpop.f32.mrb[19].mxu0  ;;  %p1700_p3 = pnand %p1699_p2, %p1693_p13 }
 0x244   :  { %v1188_v3 = vadd.f32 %v1554_v56, %v1139_v42  ;;  %v1557_v4 = vadd.f32 %v1556_v2, %v1555_v62  ;;  %v1534_v5 = vpop.f32.mrb[15].mxu1 }
 0x245   :  { %v1147_v6 = vadd.f32 %v1532_v63, %v1098_v33  ;;  %v1535_v7 = vadd.f32 %v1534_v5, %v1533_v0 }
 0x246   :  { %1305 = vst [vmem:[#allocation3] sm:$0xff] %v1188_v3  ;;  %v1191_v10 = vadd.f32 %v1557_v4, %v1142_v48  ;;  %v1282_v13 = vmul.f32 %v1188_v3, %v1188_v3 }
 0x247   :  { %v1150_v11 = vadd.f32 %v1535_v7, %v1101_v36 }
 0x248   :  { %v1268_v29 = vsel %vm1256_vm5, %v1191_v10, 0.0  ;;  %1306 = vst [vmem:[#allocation3 + $0x8] sm:$0xff] %v1191_v10  ;;  %v1558_v12 = vpop.f32.mrb[20].mxu0 }
 0x249   :  { %v1271_v14 = vadd.f32 %v1268_v29, %v1188_v3  ;;  %v1283_v26 = vmul.f32 %v1268_v29, %v1268_v29  ;;  %v1559_v59 = vpop.f32.mrb[21].mxu0 }
 0x24a   :  { %v1560_v35 = vadd.f32 %v1559_v59, %v1558_v12  ;;  %v1561_v15 = vpop.f32.mrb[22].mxu0 }
 0x24b   :  { %v1286_v44 = vadd.f32 %v1283_v26, %v1282_v13  ;;  %v1562_v45 = vpop.f32.mrb[23].mxu0 }
 0x24c   :  { %v1196_v16 = vadd.f32 %v1560_v35, %v1147_v6  ;;  %v1563_v49 = vadd.f32 %v1562_v45, %v1561_v15 }
 0x24e   :  { %v1272_v17 = vadd.f32 %v1271_v14, %v1196_v16  ;;  %v1284_v50 = vmul.f32 %v1196_v16, %v1196_v16  ;;  %1307 = vst [vmem:[#allocation3 + $0x10] sm:$0xff] %v1196_v16  ;;  %v1199_v28 = vadd.f32 %v1563_v49, %v1150_v11 }
 0x24f   :  { %v1309_v41 = vld [vmem:[#allocation3] ss:$2 sm:$0xff]  ;;  %v1313_v46 = vld [vmem:[#allocation3 + $0x1] ss:$2 sm:$0xff] }
 0x250   :  { %v1287_v55 = vadd.f32 %v1286_v44, %v1284_v50  ;;  %v1270_v9 = vsel %vm1258_vm6, %v1199_v28, 0.0  ;;  %1308 = vst [vmem:[#allocation3 + $0x18] sm:$0xff] %v1199_v28  ;;  %v1316_v52 = vadd.f32 %v1313_v46, %v1309_v41 }
 0x251   :  { %v1273_v18 = vadd.f32 %v1272_v17, %v1270_v9  ;;  %v1285_v58 = vmul.f32 %v1270_v9, %v1270_v9 }
 0x252   :  { %v1318_v63 = vmul.f32 0.5, %v1316_v52 }
 0x253   :  { %v1274_v19 = vrot.slane %v1273_v18, 4  ;;  %v1288_v20 = vadd.f32 %v1287_v55, %v1285_v58 }
 0x255   :  { %v1275_v61 = vadd.f32 %v1274_v19, %v1273_v18  ;;  %v1289_v21 = vrot.slane %v1288_v20, 4 }
 0x257   :  { %v1276_v1 = vrot.slane %v1275_v61, 2  ;;  %v1290_v22 = vadd.f32 %v1289_v21, %v1288_v20  ;;  %v1311_v42 = vld [vmem:[#allocation3 + $0x10] ss:$2 sm:$0xff]  ;;  %v1315_v47 = vld [vmem:[#allocation3 + $0x11] ss:$2 sm:$0xff] }
 0x258   :  { %v1317_v53 = vadd.f32 %v1315_v47, %v1311_v42 }
 0x259   :  { %v1277_v23 = vadd.f32 %v1276_v1, %v1275_v61  ;;  %v1291_v24 = vrot.slane %v1290_v22, 2 }
 0x25a   :  { %v1319_v0 = vmul.f32 0.5, %v1317_v53 }
 0x25b   :  { %v1278_v25 = vrot.slane %v1277_v23, 1  ;;  %v1292_v27 = vadd.f32 %v1291_v24, %v1290_v22 }
 0x25d   :  { %v1279_v31 = vadd.f32 %v1278_v25, %v1277_v23  ;;  %v1293_v32 = vrot.slane %v1292_v27, 1 }
 0x25f   :  { %v1281_v33 = vmul.f32 %v1280_v30, %v1279_v31  ;;  %v1294_v34 = vadd.f32 %v1293_v32, %v1292_v27 }
 0x261   :  { %v1295_v36 = vmul.f32 %v1294_v34, %v1280_v30  ;;  %v1296_v37 = vmul.f32 %v1281_v33, %v1281_v33 }
 0x263   :  { %v1297_v38 = vsub.f32 %v1295_v36, %v1296_v37 }
 0x265   :  { %v1299_v39 = vadd.f32 1e-05, %v1297_v38 }
 0x267   :  { %1652 = vrsqrt.f32 %v1299_v39 }
 0x271   :  { %v1653_v48 = vpop.eup %1652 }
 0x272   :  { %v1301_v51 = vmul.f32 %v1653_v48, %v1298_v40 }
 0x274   :  { %v1303_v56 = vmul.f32 %v1301_v51, %v1281_v33  ;;  %v1324_v57 = vrot.slane %v1301_v51, %v1851_v60 }
 0x276   :  { %v1304_v62 = vsub.f32 %v1302_v54, %v1303_v56  ;;  %v1326_v2 = vmul.f32 %v1324_v57, %v1318_v63  ;;  %v1327_v3 = vmul.f32 %v1324_v57, %v1319_v0 }
 0x278   :  { %v1332_v4 = vrot.slane %v1304_v62, %v1851_v60 }
 0x27a   :  { %v1334_v5 = vadd.f32 %v1332_v4, %v1326_v2  ;;  %v1335_v6 = vadd.f32 %v1332_v4, %v1327_v3 }
 0x27c   :  { %1336 = vst [vmem:[#allocation9] sm:$0xff] %v1334_v5  ;;  %1337 = vst [vmem:[#allocation9 + $0x8] sm:$0xff] %v1335_v6 }
 0x27d   :  { %1703 = shalt.err (!%p1700_p3)
}
 0x27e   :  { %s1704_s18 = scalar_lea.hbm %s1945_s8, 256 }
 0x27f   :  { %p1705_p4 = scmp.ne.s32.totalorder %s1945_s8, %s1704_s18  ;;  %p1708_p5 = scmp.lt.u32.totalorder %s1704_s18, %s1945_s8 }
 0x281   :  { %p1710_p6 = pnand %p1708_p5, %p1705_p4 }
 0x283   :  { %1713 = shalt.err (!%p1710_p6)
}
 0x284   :  { %s1727_s23 = smov 128   ;;  %s1728_s24 = smov 8  }
 0x285   :  { %1349 = dma.vmem_to_hbm [thread:$0]  %s1344_s6, 256, %s1945_s8, [#allocation6], %s1727_s23, %s1727_s23, %s1728_s24  }
 0x286   :  { %1718 = dma.done.wait [#allocation6], 256  }
 0x287   :  { %1719 = vsyncadd [#allocation6], 4294967040 }
 0x288   :  { %1353 = vsyncpa [#allocation5], 1 }
 0x289   :  { %1354 = vsyncpa [#allocation6], 1 }
 0x28a   :  { %1355 = vsyncpa [#allocation7], 1 }

</bundles_post_ra>
